<compile_context>
chip_gen: v7x
topology: tpu7x:2x2x1
jax: 0.10.0
libtpu: 0.0.40
codegen_flags: <defaults>
</compile_context>

<pallas_src>
import jax
import jax.numpy as jnp
from jax.experimental import pallas as pl
from jax.experimental.pallas import tpu as pltpu

NEG_INF = -1e30  # finite "-inf": padded class columns underflow to exp(..) == 0, no NaNs


def _round_up(x, m):
    return ((x + m - 1) // m) * m


def classification_loss_kernel(tok_ref, mask_ref, w_ref, b_ref, cnt_ref, lab_ref,
                               out_ref, acc_ref):
    """grid = (batch_tiles, seq_tiles); seq is the reduction (last, 'arbitrary') axis."""
    si = pl.program_id(1)

    @pl.when(si == 0)
    def _():
        acc_ref[...] = jnp.zeros_like(acc_ref)

    # Masked pooling on the MXU: batched bf16 matmul of the (TB, 1, TS) 0/1 mask against the
    # (TB, TS, H) bf16 token tile, accumulated in f32.  No VPU convert / multiply / reduce,
    # no f32 whole-tile temporary — the streaming phase stays HBM-bound on all generations.
    acc_ref[...] += jnp.einsum(
        "bqs,bsh->bqh", mask_ref[...], tok_ref[...],
        preferred_element_type=jnp.float32)                                   # (TB, 1, H)

    @pl.when(si == pl.num_programs(1) - 1)
    def _():
        # mean pooling: divide the accumulated sum by the per-row valid-token count (f32).
        pooled = acc_ref[:, 0, :] / cnt_ref[...]                              # (TB, H) f32
        logits = jnp.dot(pooled, w_ref[...],
                         preferred_element_type=jnp.float32) + b_ref[...]     # (TB, CP)

        # cross-entropy per row (max-subtracted logsumexp)
        mx = jnp.max(logits, axis=-1, keepdims=True)                          # (TB, 1)
        lse = mx + jnp.log(jnp.sum(jnp.exp(logits - mx), axis=-1,
                                   keepdims=True))                            # (TB, 1)
        labels = lab_ref[...]                                                 # (TB, 1) i32
        cls = jax.lax.broadcasted_iota(jnp.int32, logits.shape, 1)            # (TB, CP)
        onehot = (cls == labels).astype(jnp.float32)
        picked = jnp.sum(logits * onehot, axis=-1, keepdims=True)             # (TB, 1)

        out_ref[...] = lse - picked                                           # per-row loss


def classification_loss(token_emb, attn_mask, dense_w, dense_b, labels,
                        *, seq_tile_budget_bytes=None, vmem_limit_bytes=None):
    """token_emb: (B,S,H) (bf16 preferred); attn_mask: (B,S); dense_w: (H,C);
    dense_b: (C,); labels: (B,) int.  Returns scalar f32 mean cross-entropy loss."""
    B, S, H = token_emb.shape
    C = dense_w.shape[1]
    tok_bytes = jnp.dtype(token_emb.dtype).itemsize

    # ---- per-generation VMEM sizing (v5e/v6e 128 MiB, v7x 64 MiB physical) ----
    try:
        vmem_cap = int(pltpu.get_tpu_info().vmem_capacity_bytes)
    except Exception:
        vmem_cap = 64 << 20  # conservative (v7x) fallback
    if seq_tile_budget_bytes is None:
        seq_tile_budget_bytes = max(4 << 20, vmem_cap // 6)   # per token buffer (x2 in flight)
    if vmem_limit_bytes is None:
        vmem_limit_bytes = min(int(vmem_cap * 0.85), 100 << 20)

    # ---- class padding to a lane-dense width (zeros in W, -1e30 in bias) ----
    CP = _round_up(max(C, 128), 128)
    w_p = jnp.zeros((H, CP), jnp.float32).at[:, :C].set(dense_w.astype(jnp.float32))
    b_p = jnp.full((1, CP), NEG_INF, jnp.float32).at[0, :C].set(dense_b.astype(jnp.float32))

    # ---- batch tile: always a divisor of B (never forces a pad copy of the token stream);
    #      pick >=2 batch tiles when that is free so v7x's 'parallel' axis uses both TCs ----
    TB = B
    for cand in (128, 64, 32, 16, 8):
        if B % cand == 0 and B // cand >= 2:
            TB = cand
            break
    NB = B // TB

    # ---- seq tile: whole S if it fits the budget (no padding at all), otherwise a multiple
    #      of 128 (lane-dense mask block, sublane-aligned token block), preferring a divisor
    #      of S so the token stream is never copied just to pad ----
    bytes_per_pos = TB * H * tok_bytes
    if S * bytes_per_pos <= seq_tile_budget_bytes:
        TS, Sp = S, S
    else:
        TS = max(128, (seq_tile_budget_bytes // bytes_per_pos) // 128 * 128)
        if S % 128 == 0:
            t = min(TS, S)
            while t >= 128 and S % t != 0:
                t -= 128
            if t >= 128:
                TS = t
        TS = min(TS, _round_up(S, 128))
        Sp = _round_up(S, TS)
    NS = Sp // TS

    # ---- pad the big token stream only when strictly necessary ----
    if Sp != S:
        # TODO(synk): handle the ragged last seq tile in-kernel to avoid this copy entirely.
        tok_in = jnp.pad(token_emb, ((0, 0), (0, Sp - S), (0, 0)))
    else:
        tok_in = token_emb

    mask_f = attn_mask.astype(jnp.float32)
    counts = jnp.maximum(jnp.sum(mask_f, axis=1, keepdims=True), 1e-9)        # (B, 1) f32
    mask3 = jnp.zeros((B, 1, Sp), jnp.bfloat16).at[:, 0, :S].set(
        attn_mask.astype(jnp.bfloat16))                                       # exact 0/1
    lab2 = labels.astype(jnp.int32).reshape(B, 1)

    cost = pl.CostEstimate(
        flops=2 * B * Sp * H + 2 * B * H * CP,
        transcendentals=B * (CP + 1),
        bytes_accessed=(B * Sp * H * tok_bytes + B * Sp * 2 + H * CP * 4
                        + CP * 4 + 3 * B * 4),
    )

    per_row = pl.pallas_call(
        classification_loss_kernel,
        out_shape=jax.ShapeDtypeStruct((B, 1), jnp.float32),
        grid_spec=pltpu.PrefetchScalarGridSpec(
            num_scalar_prefetch=0,
            grid=(NB, NS),
            in_specs=[
                pl.BlockSpec((TB, TS, H), lambda bi, si: (bi, si, 0)),   # token stream (bf16)
                pl.BlockSpec((TB, 1, TS), lambda bi, si: (bi, 0, si)),   # 0/1 mask, lane-dense
                pl.BlockSpec((H, CP), lambda bi, si: (0, 0)),            # dense W (resident)
                pl.BlockSpec((1, CP), lambda bi, si: (0, 0)),            # dense bias
                pl.BlockSpec((TB, 1), lambda bi, si: (bi, 0)),           # valid-token counts
                pl.BlockSpec((TB, 1), lambda bi, si: (bi, 0)),           # labels
            ],
            out_specs=pl.BlockSpec((TB, 1), lambda bi, si: (bi, 0)),     # per-example loss
            scratch_shapes=[pltpu.VMEM((TB, 1, H), jnp.float32)],        # pooled-sum acc
        ),
        compiler_params=pltpu.CompilerParams(
            dimension_semantics=("parallel", "arbitrary"),
            vmem_limit_bytes=vmem_limit_bytes,
        ),
        cost_estimate=cost,
    )(tok_in, mask3, w_p, b_p, counts, lab2)

    return jnp.mean(per_row[:, 0])


if __name__ == "__main__":
    # Small synthetic shapes consistent with the module:
    #   batch=8 sentences, seq=16 tokens, hidden=32 (stand-in for MiniLM's 384),
    #   num_classes=14 (MMLU-Pro categories).
    B, S, H, C = 8, 16, 32, 14

    key = jax.random.PRNGKey(0)
    k_tok, k_len, k_w, k_b, k_lab = jax.random.split(key, 5)

    # bf16 token embeddings (the backbone's natural activation dtype -> halves HBM bytes)
    token_emb = jax.random.normal(k_tok, (B, S, H), dtype=jnp.bfloat16)

    # Deterministic variable-length attention mask (at least 1 valid token each).
    lengths = jax.random.randint(k_len, (B,), minval=1, maxval=S + 1)
    attn_mask = (jnp.arange(S)[None, :] < lengths[:, None]).astype(jnp.float32)

    # Dense layer parameters (torch stores (C, H); we keep (H, C) layout).
    dense_w = 0.05 * jax.random.normal(k_w, (H, C), dtype=jnp.float32)
    dense_b = 0.01 * jax.random.normal(k_b, (C,), dtype=jnp.float32)

    labels = jax.random.randint(k_lab, (B,), minval=0, maxval=C)

    loss = classification_loss(token_emb, attn_mask, dense_w, dense_b, labels)
    loss = jax.block_until_ready(loss)

    # Pure-JAX reference (same f32 compute on the bf16 token stream).
    tok32 = token_emb.astype(jnp.float32)
    pooled = (tok32 * attn_mask[:, :, None]).sum(1) / jnp.maximum(
        attn_mask.sum(1, keepdims=True), 1e-9)
    logits = pooled @ dense_w + dense_b
    ref = jnp.mean(
        jax.nn.logsumexp(logits, axis=-1)
        - jnp.take_along_axis(logits, labels[:, None], axis=-1)[:, 0])
    assert jnp.allclose(loss, ref, atol=1e-4, rtol=1e-4), (loss, ref)

    print("KERNEL_OK")
</pallas_src>

<mosaic_0001>
module attributes {stable_mosaic.version = 11 : i64} {
  func.func @classification_loss_kernel(%arg0: i32, %arg1: i32, %arg2: memref<8x16x32xbf16, #tpu.memory_space<vmem>>, %arg3: memref<8x1x16xbf16, #tpu.memory_space<vmem>>, %arg4: memref<32x128xf32, #tpu.memory_space<vmem>>, %arg5: memref<1x128xf32, #tpu.memory_space<vmem>>, %arg6: memref<8x1xf32, #tpu.memory_space<vmem>>, %arg7: memref<8x1xi32, #tpu.memory_space<vmem>>, %arg8: memref<8x1xf32, #tpu.memory_space<vmem>>, %arg9: memref<8x1x32xf32, #tpu.memory_space<vmem>>) attributes {dimension_semantics = [#tpu.dimension_semantics<parallel>, #tpu.dimension_semantics<arbitrary>], iteration_bounds = array<i64: 1, 1>, scalar_prefetch = 0 : i64, scratch_operands = 1 : i64, tpu.core_type = #tpu.core_type<tc>, window_params = [{transform_indices = @transform_0, window_bounds = array<i64: 8, 16, 32>}, {transform_indices = @transform_1, window_bounds = array<i64: 8, 1, 16>}, {pipeline_mode = #tpu.pipeline_mode<synchronous>, transform_indices = @transform_2, window_bounds = array<i64: 32, 128>}, {pipeline_mode = #tpu.pipeline_mode<synchronous>, transform_indices = @transform_3, window_bounds = array<i64: 1, 128>}, {transform_indices = @transform_4, window_bounds = array<i64: 8, 1>}, {transform_indices = @transform_5, window_bounds = array<i64: 8, 1>}, {transform_indices = @transform_6, window_bounds = array<i64: 8, 1>}]} {
    %c0_i32 = arith.constant 0 : i32
    %0 = arith.cmpi eq, %arg1, %c0_i32 : i32
    %1 = arith.extui %0 : i1 to i32
    %c0_i32_0 = arith.constant 0 : i32
    %2 = arith.cmpi ne, %1, %c0_i32_0 : i32
    scf.if %2 {
      %cst_14 = arith.constant 0.000000e+00 : f32
      %12 = vector.broadcast %cst_14 : f32 to vector<8x1x32xf32>
      %c0_15 = arith.constant 0 : index
      %c0_16 = arith.constant 0 : index
      %c0_17 = arith.constant 0 : index
      %13 = vector.load %arg9[%c0_15, %c0_16, %c0_17] : memref<8x1x32xf32, #tpu.memory_space<vmem>>, vector<8x1x32xf32>
      tpu.vector_store %arg9[%c0_15, %c0_16, %c0_17], %12 {strides = array<i32>} : memref<8x1x32xf32, #tpu.memory_space<vmem>>, vector<8x1x32xf32>,
    } else {
    }
    %c0 = arith.constant 0 : index
    %c0_1 = arith.constant 0 : index
    %c0_2 = arith.constant 0 : index
    %3 = vector.load %arg9[%c0, %c0_1, %c0_2] : memref<8x1x32xf32, #tpu.memory_space<vmem>>, vector<8x1x32xf32>
    %c0_3 = arith.constant 0 : index
    %c0_4 = arith.constant 0 : index
    %c0_5 = arith.constant 0 : index
    %4 = vector.load %arg3[%c0_3, %c0_4, %c0_5] : memref<8x1x16xbf16, #tpu.memory_space<vmem>>, vector<8x1x16xbf16>
    %c0_6 = arith.constant 0 : index
    %c0_7 = arith.constant 0 : index
    %c0_8 = arith.constant 0 : index
    %5 = vector.load %arg2[%c0_6, %c0_7, %c0_8] : memref<8x16x32xbf16, #tpu.memory_space<vmem>>, vector<8x16x32xbf16>
    "tpu.trace_start"() <{level = 10 : i32, message = "bqs,bsh->bqh"}> : () -> ()
    %cst = arith.constant dense<0.000000e+00> : vector<8x1x32xf32>
    %6 = tpu.matmul %4, %5, %cst {dimension_numbers = #tpu.dot_dimension_numbers<[2], [1], [1], [2], [0, 0, 0, 1, 1, 2], [0], [0]>} : vector<8x1x16xbf16>, vector<8x16x32xbf16>, vector<8x1x32xf32> -> vector<8x1x32xf32>
    "tpu.trace_stop"() : () -> ()
    %7 = arith.addf %3, %6 : vector<8x1x32xf32>
    %c0_9 = arith.constant 0 : index
    %c0_10 = arith.constant 0 : index
    %c0_11 = arith.constant 0 : index
    %8 = vector.load %arg9[%c0_9, %c0_10, %c0_11] : memref<8x1x32xf32, #tpu.memory_space<vmem>>, vector<8x1x32xf32>
    tpu.vector_store %arg9[%c0_9, %c0_10, %c0_11], %7 {strides = array<i32>} : memref<8x1x32xf32, #tpu.memory_space<vmem>>, vector<8x1x32xf32>,
    %c0_i32_12 = arith.constant 0 : i32
    %9 = arith.cmpi eq, %arg1, %c0_i32_12 : i32
    %10 = arith.extui %9 : i1 to i32
    %c0_i32_13 = arith.constant 0 : i32
    %11 = arith.cmpi ne, %10, %c0_i32_13 : i32
    scf.if %11 {
      %c0_14 = arith.constant 0 : index
      %c0_15 = arith.constant 0 : index
      %c0_16 = arith.constant 0 : index
      %12 = vector.load %arg9[%c0_14, %c0_15, %c0_16] : memref<8x1x32xf32, #tpu.memory_space<vmem>>, vector<8x1x32xf32>
      %13 = vector.shape_cast %12 : vector<8x1x32xf32> to vector<8x32xf32>
      %c0_17 = arith.constant 0 : index
      %c0_18 = arith.constant 0 : index
      %14 = vector.load %arg6[%c0_17, %c0_18] : memref<8x1xf32, #tpu.memory_space<vmem>>, vector<8x1xf32>
      %15 = vector.broadcast %14 : vector<8x1xf32> to vector<8x32xf32>
      %16 = arith.divf %13, %15 : vector<8x32xf32>
      %c0_19 = arith.constant 0 : index
      %c0_20 = arith.constant 0 : index
      %17 = vector.load %arg4[%c0_19, %c0_20] : memref<32x128xf32, #tpu.memory_space<vmem>>, vector<32x128xf32>
      %cst_21 = arith.constant dense<0.000000e+00> : vector<8x128xf32>
      %18 = tpu.matmul %16, %17, %cst_21 {dimension_numbers = #tpu.dot_dimension_numbers<[1], [0], [0], [1], [0, 0, 1, 1], [], []>} : vector<8x32xf32>, vector<32x128xf32>, vector<8x128xf32> -> vector<8x128xf32>
      %c0_22 = arith.constant 0 : index
      %c0_23 = arith.constant 0 : index
      %19 = vector.load %arg5[%c0_22, %c0_23] : memref<1x128xf32, #tpu.memory_space<vmem>>, vector<1x128xf32>
      %20 = vector.broadcast %19 : vector<1x128xf32> to vector<8x128xf32>
      %21 = arith.addf %18, %20 : vector<8x128xf32>
      %cst_24 = arith.constant dense<0xFF800000> : vector<8xf32>
      %22 = vector.multi_reduction <maximumf>, %21, %cst_24 [1] : vector<8x128xf32> to vector<8xf32>
      %23 = vector.shape_cast %22 : vector<8xf32> to vector<8x1xf32>
      %24 = vector.broadcast %23 : vector<8x1xf32> to vector<8x128xf32>
      %25 = arith.subf %21, %24 : vector<8x128xf32>
      %26 = math.exp %25 : vector<8x128xf32>
      %cst_25 = arith.constant dense<0.000000e+00> : vector<8xf32>
      %27 = vector.multi_reduction <add>, %26, %cst_25 [1] : vector<8x128xf32> to vector<8xf32>
      %28 = vector.shape_cast %27 : vector<8xf32> to vector<8x1xf32>
      %29 = math.log %28 : vector<8x1xf32>
      %30 = arith.addf %23, %29 : vector<8x1xf32>
      %c0_26 = arith.constant 0 : index
      %c0_27 = arith.constant 0 : index
      %31 = vector.load %arg7[%c0_26, %c0_27] : memref<8x1xi32, #tpu.memory_space<vmem>>, vector<8x1xi32>
      %32 = tpu.iota {dimensions = array<i32: 1>} : vector<8x128xi32>
      %33 = vector.broadcast %31 : vector<8x1xi32> to vector<8x128xi32>
      %34 = arith.cmpi eq, %32, %33 : vector<8x128xi32>
      %35 = arith.extui %34 : vector<8x128xi1> to vector<8x128xi32>
      %36 = arith.sitofp %35 : vector<8x128xi32> to vector<8x128xf32>
      %37 = arith.mulf %21, %36 : vector<8x128xf32>
      %cst_28 = arith.constant dense<0.000000e+00> : vector<8xf32>
      %38 = vector.multi_reduction <add>, %37, %cst_28 [1] : vector<8x128xf32> to vector<8xf32>
      %39 = vector.shape_cast %38 : vector<8xf32> to vector<8x1xf32>
      %40 = arith.subf %30, %39 : vector<8x1xf32>
      %c0_29 = arith.constant 0 : index
      %c0_30 = arith.constant 0 : index
      %41 = vector.load %arg8[%c0_29, %c0_30] : memref<8x1xf32, #tpu.memory_space<vmem>>, vector<8x1xf32>
      tpu.vector_store %arg8[%c0_29, %c0_30], %40 {strides = array<i32>} : memref<8x1xf32, #tpu.memory_space<vmem>>, vector<8x1xf32>,
    } else {
    }
    return
  }
  func.func @transform_0(%arg0: i32, %arg1: i32) -> (i32, i32, i32) {
    %c0_i32 = arith.constant 0 : i32
    %c0_i32_0 = arith.constant 0 : i32
    return %arg0, %arg1, %c0_i32 : i32, i32, i32
  }
  func.func @transform_1(%arg0: i32, %arg1: i32) -> (i32, i32, i32) {
    %c0_i32 = arith.constant 0 : i32
    %c0_i32_0 = arith.constant 0 : i32
    return %arg0, %c0_i32, %arg1 : i32, i32, i32
  }
  func.func @transform_2(%arg0: i32, %arg1: i32) -> (i32, i32) {
    %c0_i32 = arith.constant 0 : i32
    %c0_i32_0 = arith.constant 0 : i32
    %c0_i32_1 = arith.constant 0 : i32
    return %c0_i32, %c0_i32_0 : i32, i32
  }
  func.func @transform_3(%arg0: i32, %arg1: i32) -> (i32, i32) {
    %c0_i32 = arith.constant 0 : i32
    %c0_i32_0 = arith.constant 0 : i32
    %c0_i32_1 = arith.constant 0 : i32
    return %c0_i32, %c0_i32_0 : i32, i32
  }
  func.func @transform_4(%arg0: i32, %arg1: i32) -> (i32, i32) {
    %c0_i32 = arith.constant 0 : i32
    %c0_i32_0 = arith.constant 0 : i32
    return %arg0, %c0_i32 : i32, i32
  }
  func.func @transform_5(%arg0: i32, %arg1: i32) -> (i32, i32) {
    %c0_i32 = arith.constant 0 : i32
    %c0_i32_0 = arith.constant 0 : i32
    return %arg0, %c0_i32 : i32, i32
  }
  func.func @transform_6(%arg0: i32, %arg1: i32) -> (i32, i32) {
    %c0_i32 = arith.constant 0 : i32
    %c0_i32_0 = arith.constant 0 : i32
    return %arg0, %c0_i32 : i32, i32
  }
}

</mosaic_0001>

<bundles_post_ra>
// kernel: tpu_custom_call.1
= control target key start
LH: loop header
LB: loop body
LE: loop exit
PB: predicated region body
PF: predicated region fallthrough
CT: control target
= control target key end

     0   :  { %11 = vsyncpa [#allocation4], 0  ;;  %s903_s21 = smov [#allocation3]   ;;  %s1078_s0 = inlined_call_operand.hbm [shape: bf16[8,16,32], index: 0, kind: input, shape index: {}]   ;;  %s1079_s1 = inlined_call_operand.vmem [shape: bf16[8,1,16], index: 1, kind: input, shape index: {}]   ;;  %s1080_s2 = inlined_call_operand.vmem [shape: f32[32,128], index: 2, kind: input, shape index: {}]   ;;  %s1081_s3 = inlined_call_operand.vmem [shape: f32[1,128], index: 3, kind: input, shape index: {}]   ;;  %s1082_s4 = inlined_call_operand.vmem [shape: f32[8,1], index: 4, kind: input, shape index: {}]   ;;  %s1083_s5 = inlined_call_operand.vmem [shape: s32[8,1], index: 5, kind: input, shape index: {}]   ;;  %s1084_s6 = inlined_call_operand.vmem [shape: f32[8,1], index: 6, kind: output, shape index: {}]  }
   0x1   :  { %s17_s22 = sshll.u32 %s903_s21, 4  ;;  %s879_s25 = scalar_lea.hbm %s1078_s0, 1024  ;;  %s18_s22 = int_to_ptr.vmem [resolvable:$true] %s17_s22 }
   0x2   :  { %p880_p0 = scmp.ne.s32.totalorder %s1078_s0, %s879_s25  ;;  %p883_p1 = scmp.lt.u32.totalorder %s879_s25, %s1078_s0 }
   0x4   :  { %p885_p2 = pnand %p883_p1, %p880_p0 }
   0x6   :  { %888 = shalt.err (!%p885_p2)
}
   0x7   :  { %s889_s30 = scalar_lea.vmem %s18_s22, 1024  ;;  %p894_p4 = scmp.lt.s32.totalorder %s18_s22, %s18_s22 }
   0x8   :  { %p890_p3 = scmp.ne.s32.totalorder %s18_s22, %s889_s30  ;;  %p895_p5 = scmp.lt.s32.totalorder %s889_s30, %s889_s30 }
   0xa   :  { %p896_p6 = por %p895_p5, %p894_p4 }
   0xc   :  { %p897_p7 = pnand %p896_p6, %p890_p3 }
   0xe   :  { %900 = shalt.err (!%p897_p7)
}
   0xf   :  { %s904_s7 = smov 64   ;;  %s905_s8 = smov 4  }
  0x10   :  { %23 = dma.hbm_to_vmem [thread:$0]  %s1078_s0, 1024, %s18_s22, [#allocation4], %s904_s7, %s904_s7, %s905_s8  }
  0x11   :  { %901 = dma.done.wait [#allocation4], 1024  }
  0x12   :  { %902 = vsyncadd [#allocation4], 4294966272  ;;  %v906_v0 = vmov 0.0   ;;  %vm907_vm0 = vmmov 0   ;;  %v908_v1 = vmov 0   ;;  %v851_v2 = vld [vmem:[#allocation3] sm:$0xff]   ;;  %v509_v29 = vlaneseq }
  0x13   :  { %776 = vmatprep.subr.bf16.mxu0 %v906_v0  ;;  %782 = vmatprep.subr.bf16.mxu1 %v906_v0  ;;  %v852_v3 = vld [vmem:[#allocation3 + $0x8] sm:$0xff]   ;;  %vm89_vm1 = vcmask 130048   ;;  %v59_v4 = vld [vmem:[%s1079_s1] sm:$0x1]  ;;  %v60_v5 = vld [vmem:[%s1079_s1 + $0x1] sm:$0x1] }
  0x14   :  { %778 = vmatprep.mubr.msk.bf16.mxu0 %vm907_vm0, %v906_v0  ;;  %784 = vmatprep.mubr.msk.bf16.mxu1 %vm907_vm0, %v906_v0  ;;  %v853_v6 = vld [vmem:[#allocation3 + $0x10] sm:$0xff]   ;;  %v854_v7 = vld [vmem:[#allocation3 + $0x18] sm:$0xff]   ;;  %v855_v9 = vld [vmem:[#allocation3 + $0x20] sm:$0xff]   ;;  %vm42_vm2 = vcmask 253952   ;;  %v909_v22 = vmov 0.0|0.0   ;;  %v1052_v39 = vshrl.u32 %v509_v29, 7 }
  0x15   :  { %849 = vset.pattern.permute.xlu0 %v908_v1  ;;  %850 = vset.pattern.permute.xlu1 %v908_v1  ;;  %v61_v8 = vld [vmem:[%s1079_s1 + $0x2] sm:$0x1]  ;;  %v62_v11 = vld [vmem:[%s1079_s1 + $0x3] sm:$0x1]  ;;  %v856_v12 = vld [vmem:[#allocation3 + $0x28] sm:$0xff]   ;;  %vm633_vm3 = vcmask 261120  }
  0x16   :  { %777 = vmatpush3.bf16.msra.mxu0 %v851_v2  ;;  %783 = vmatpush3.bf16.msra.mxu1 %v852_v3  ;;  %v504_v10 = vld [vmem:[%s1082_s4] sm:$0xff]  ;;  %v857_v14 = vld [vmem:[#allocation3 + $0x30] sm:$0xff]   ;;  %43 = vst.msk [vmem:[#allocation2] sm:$0x1] %vm42_vm2, %v906_v0  ;;  %44 = vst.msk [vmem:[#allocation2 + $0x1] sm:$0x1] %vm42_vm2, %v906_v0 }
  0x17   :  { %788 = vmatprep.subr.bf16.mxu0 %v906_v0  ;;  %794 = vmatprep.subr.bf16.mxu1 %v906_v0  ;;  %v63_v13 = vld [vmem:[%s1079_s1 + $0x4] sm:$0x1]  ;;  %v64_v15 = vld [vmem:[%s1079_s1 + $0x5] sm:$0x1]  ;;  %45 = vst.msk [vmem:[#allocation2 + $0x2] sm:$0x1] %vm42_vm2, %v906_v0 }
  0x18   :  { %507 = vperm.xlu0 %849, %v504_v10   ;;  %v858_v16 = vld [vmem:[#allocation3 + $0x38] sm:$0xff]   ;;  %46 = vst.msk [vmem:[#allocation2 + $0x3] sm:$0x1] %vm42_vm2, %v906_v0  ;;  %47 = vst.msk [vmem:[#allocation2 + $0x4] sm:$0x1] %vm42_vm2, %v906_v0  ;;  %v566_v20 = vld [vmem:[%s1080_s2 + $0x8] sm:$0xff] }
  0x19   :  { %779 = vmatmul.mubr.msk.bf16.vlgmr.msra.gmra.mrb[0].mxu0 %vm89_vm1, %v59_v4  ;;  %785 = vmatmul.mubr.msk.bf16.vlgmr.msra.gmra.mrb[0].mxu1 %vm89_vm1, %v60_v5  ;;  %48 = vst.msk [vmem:[#allocation2 + $0x5] sm:$0x1] %vm42_vm2, %v906_v0  ;;  %49 = vst.msk [vmem:[#allocation2 + $0x6] sm:$0x1] %vm42_vm2, %v906_v0  ;;  %v65_v17 = vld [vmem:[%s1079_s1 + $0x6] sm:$0x1] }
  0x1a   :  { %789 = vmatpush3.bf16.msra.mxu0 %v853_v6  ;;  %795 = vmatpush3.bf16.msra.mxu1 %v854_v7  ;;  %50 = vst.msk [vmem:[#allocation2 + $0x7] sm:$0x1] %vm42_vm2, %v906_v0  ;;  %v66_v18 = vld [vmem:[%s1079_s1 + $0x7] sm:$0x1]  ;;  %v567_v21 = vld [vmem:[%s1080_s2 + $0x10] sm:$0xff]  ;;  %v568_v24 = vld [vmem:[%s1080_s2 + $0x18] sm:$0xff] }
  0x1b   :  { %790 = vmatprep.mubr.msk.bf16.mxu0 %vm907_vm0, %v906_v0  ;;  %796 = vmatprep.mubr.msk.bf16.mxu1 %vm907_vm0, %v906_v0  ;;  %v565_v19 = vld [vmem:[%s1080_s2] sm:$0xff]  ;;  %v839_v25 = vpack.c.bf16 %v568_v24, %v567_v21  ;;  %v519_v41 = vsub.s32 2, %v1052_v39  ;;  %v523_v43 = vsub.s32 3, %v1052_v39  ;;  %v511_v45 = vsub.s32 0, %v1052_v39 }
  0x1c   :  { %800 = vmatprep.subr.bf16.mxu0 %v906_v0  ;;  %806 = vmatprep.subr.bf16.mxu1 %v906_v0  ;;  %v836_v23 = vpack.c.bf16 %v566_v20, %v565_v19  ;;  %v716_v26 = vld [vmem:[%s1083_s5] sm:$0xff]  ;;  %v515_v48 = vsub.s32 1, %v1052_v39  ;;  %v527_v52 = vsub.s32 4, %v1052_v39  ;;  %v531_v57 = vsub.s32 5, %v1052_v39 }
  0x1d   :  { %720 = vperm.xlu1 %850, %v716_v26   ;;  %v51_v27 = vld [vmem:[#allocation2] sm:$0x1]  ;;  %v52_v28 = vld [vmem:[#allocation2 + $0x1] sm:$0x1]  ;;  %v535_v1 = vsub.s32 6, %v1052_v39  ;;  %v539_v4 = vsub.s32 7, %v1052_v39 }
  0x1e   :  { %v53_v42 = vld [vmem:[#allocation2 + $0x2] sm:$0x1]  ;;  %vm729_vm5 = vcmask 7168  }
  0x1f   :  { %v54_v44 = vld [vmem:[#allocation2 + $0x3] sm:$0x1]  ;;  %v55_v3 = vld [vmem:[#allocation2 + $0x4] sm:$0x1] }
  0x20   :  { %v56_v6 = vld [vmem:[#allocation2 + $0x5] sm:$0x1]  ;;  %v57_v19 = vld [vmem:[#allocation2 + $0x6] sm:$0x1] }
  0x21   :  { %791 = vmatmul.mubr.msk.bf16.vlgmr.msra.gmra.mrb[4].mxu0 %vm89_vm1, %v61_v8  ;;  %797 = vmatmul.mubr.msk.bf16.vlgmr.msra.gmra.mrb[4].mxu1 %vm89_vm1, %v62_v11  ;;  %v58_v20 = vld [vmem:[#allocation2 + $0x7] sm:$0x1] }
  0x22   :  { %801 = vmatpush3.bf16.msra.mxu0 %v855_v9  ;;  %807 = vmatpush3.bf16.msra.mxu1 %v856_v12 }
  0x23   :  { %802 = vmatprep.mubr.msk.bf16.mxu0 %vm907_vm0, %v906_v0  ;;  %808 = vmatprep.mubr.msk.bf16.mxu1 %vm907_vm0, %v906_v0 }
  0x24   :  { %812 = vmatprep.subr.bf16.mxu0 %v906_v0  ;;  %818 = vmatprep.subr.bf16.mxu1 %v906_v0 }
  0x29   :  { %803 = vmatmul.mubr.msk.bf16.vlgmr.msra.gmra.mrb[8].mxu0 %vm89_vm1, %v63_v13  ;;  %809 = vmatmul.mubr.msk.bf16.vlgmr.msra.gmra.mrb[8].mxu1 %vm89_vm1, %v64_v15 }
  0x2a   :  { %813 = vmatpush3.bf16.msra.mxu0 %v857_v14  ;;  %819 = vmatpush3.bf16.msra.mxu1 %v858_v16 }
  0x2b   :  { %814 = vmatprep.mubr.msk.bf16.mxu0 %vm907_vm0, %v906_v0  ;;  %820 = vmatprep.mubr.msk.bf16.mxu1 %vm907_vm0, %v906_v0 }
  0x2c   :  { %835 = vmatprep.subr.bf16.mxu0 %v909_v22 }
  0x31   :  { %815 = vmatmul.mubr.msk.bf16.vlgmr.msra.gmra.mrb[12].mxu0 %vm89_vm1, %v65_v17  ;;  %821 = vmatmul.mubr.msk.bf16.vlgmr.msra.gmra.mrb[12].mxu1 %vm89_vm1, %v66_v18 }
  0x32   :  { %832 = vmatprep.mubr.msk.f32.mxu0 %vm907_vm0, %v906_v0  ;;  %837 = vmatpush3.bf16.msra.mxu0 %v836_v23 }
  0x33   :  { %838 = vmatprep.subr.bf16.mxu0 %v909_v22 }
  0x36   :  { %840 = vmatpush3.bf16.msra.mxu0 %v839_v25 }
  0x97   :  { %v508_v46 = vpop.permute.xlu0 %507 }
  0x98   :  { %v520_v53 = vrot.slane %v508_v46, %v519_v41  ;;  %v524_v58 = vrot.slane %v508_v46, %v523_v43  ;;  %v512_v61 = vrot.slane %v508_v46, %v511_v45  ;;  %v516_v63 = vrot.slane %v508_v46, %v515_v48 }
  0x99   :  { %v528_v2 = vrot.slane %v508_v46, %v527_v52  ;;  %v532_v5 = vrot.slane %v508_v46, %v531_v57  ;;  %v536_v11 = vrot.slane %v508_v46, %v535_v1  ;;  %v540_v15 = vrot.slane %v508_v46, %v539_v4 }
  0x9a   :  { %859 = vrcp.f32 %v520_v53 }
  0x9b   :  { %861 = vrcp.f32 %v524_v58 }
  0x9c   :  { %863 = vrcp.f32 %v512_v61 }
  0x9d   :  { %865 = vrcp.f32 %v516_v63 }
  0x9e   :  { %867 = vrcp.f32 %v528_v2 }
  0x9f   :  { %869 = vrcp.f32 %v532_v5 }
  0xa0   :  { %871 = vrcp.f32 %v536_v11  ;;  %v718_v11 = vand.u32 127, %v509_v29 }
  0xa1   :  { %873 = vrcp.f32 %v540_v15 }
  0xa4   :  { %v860_v21 = vpop.eup %859 }
  0xa5   :  { %v862_v23 = vpop.eup %861 }
  0xec   :  { %v127_v30 = vpop.f32.mrb[0].mxu0  ;;  %v176_v32 = vpop.f32.mrb[0].mxu1 }
  0xed   :  { %v476_v31 = vadd.f32 %v127_v30, %v51_v27  ;;  %v780_v33 = vpop.f32.mrb[1].mxu0  ;;  %v477_v34 = vadd.f32 %v176_v32, %v52_v28  ;;  %v786_v35 = vpop.f32.mrb[1].mxu1 }
  0xee   :  { %v130_v36 = vpop.f32.mrb[2].mxu0  ;;  %v179_v37 = vpop.f32.mrb[2].mxu1 }
  0xef   :  { %485 = vst.msk [vmem:[#allocation2] sm:$0x1] %vm42_vm2, %v476_v31  ;;  %v781_v38 = vpop.f32.mrb[3].mxu0  ;;  %486 = vst.msk [vmem:[#allocation2 + $0x1] sm:$0x1] %vm42_vm2, %v477_v34  ;;  %v787_v40 = vpop.f32.mrb[3].mxu1 }
  0xf0   :  { %v864_v30 = vpop.eup %863  ;;  %v910_v34 = vmov 1966171168  }
  0xf1   :  { %v589_v35 = vunpack.c.l.s4 %v910_v34  ;;  %v866_v36 = vpop.eup %865 }
  0xf4   :  { %v225_v47 = vpop.f32.mrb[4].mxu0  ;;  %v274_v50 = vpop.f32.mrb[4].mxu1 }
  0xf5   :  { %v478_v49 = vadd.f32 %v225_v47, %v53_v42  ;;  %v792_v51 = vpop.f32.mrb[5].mxu0  ;;  %v479_v54 = vadd.f32 %v274_v50, %v54_v44  ;;  %v798_v55 = vpop.f32.mrb[5].mxu1 }
  0xf6   :  { %v228_v56 = vpop.f32.mrb[6].mxu0  ;;  %v277_v59 = vpop.f32.mrb[6].mxu1  ;;  %v496_v40 = vld [vmem:[#allocation2] sm:$0x1]  ;;  %v497_v41 = vld [vmem:[#allocation2 + $0x1] sm:$0x1]  ;;  %v590_v51 = vunpack.c.0.s8 %v589_v35 }
  0xf7   :  { %487 = vst.msk [vmem:[#allocation2 + $0x2] sm:$0x1] %vm42_vm2, %v478_v49  ;;  %v793_v60 = vpop.f32.mrb[7].mxu0  ;;  %488 = vst.msk [vmem:[#allocation2 + $0x3] sm:$0x1] %vm42_vm2, %v479_v54  ;;  %v799_v62 = vpop.f32.mrb[7].mxu1  ;;  %v550_v49 = vmul.f32 %v864_v30, %v496_v40  ;;  %v552_v50 = vmul.f32 %v866_v36, %v497_v41 }
  0xf8   :  { %v868_v42 = vpop.eup %867  ;;  %v593_v59 = vsub.s32 %v590_v51, %v1052_v39  ;;  %v752_v39 = vld [vmem:[%s1081_s3] ss:$0 sm:$0xff] }
  0xf9   :  { %v870_v46 = vpop.eup %869  ;;  %v584_v58 = vcombine.low %v550_v49, %v552_v50 }
  0xfa   :  { %v872_v52 = vpop.eup %871 }
  0xfb   :  { %v874_v56 = vpop.eup %873 }
  0xfc   :  { %v323_v7 = vpop.f32.mrb[8].mxu0  ;;  %v372_v9 = vpop.f32.mrb[8].mxu1 }
  0xfd   :  { %v480_v8 = vadd.f32 %v323_v7, %v55_v3  ;;  %v804_v10 = vpop.f32.mrb[9].mxu0  ;;  %v481_v12 = vadd.f32 %v372_v9, %v56_v6  ;;  %v810_v13 = vpop.f32.mrb[9].mxu1  ;;  %v594_v3 = vrot.slane %v584_v58, %v593_v59 }
  0xfe   :  { %v326_v14 = vpop.f32.mrb[10].mxu0  ;;  %v375_v16 = vpop.f32.mrb[10].mxu1  ;;  %v498_v27 = vld [vmem:[#allocation2 + $0x2] sm:$0x1]  ;;  %v499_v28 = vld [vmem:[#allocation2 + $0x3] sm:$0x1] }
  0xff   :  { %489 = vst.msk [vmem:[#allocation2 + $0x4] sm:$0x1] %vm42_vm2, %v480_v8  ;;  %v805_v17 = vpop.f32.mrb[11].mxu0  ;;  %490 = vst.msk [vmem:[#allocation2 + $0x5] sm:$0x1] %vm42_vm2, %v481_v12  ;;  %v811_v18 = vpop.f32.mrb[11].mxu1  ;;  %v554_v44 = vmul.f32 %v860_v21, %v498_v27  ;;  %v556_v45 = vmul.f32 %v862_v23, %v499_v28 }
 0x100   :  { %v721_v12 = vpop.permute.xlu1 %720 }
 0x101   :  { %v585_v55 = vcombine.low %v554_v44, %v556_v45  ;;  %vm722_vm4 = vcmp.eq.s32.totalorder %v718_v11, %v721_v12 }
 0x102   :  { %v754_v16 = vsel %vm722_vm4, 1.0, %v906_v0 }
 0x103   :  { %v601_v1 = vrot.slane %v585_v55, %v593_v59 }
 0x104   :  { %v421_v22 = vpop.f32.mrb[12].mxu0  ;;  %v470_v25 = vpop.f32.mrb[12].mxu1 }
 0x105   :  { %v482_v24 = vadd.f32 %v421_v22, %v57_v19  ;;  %v816_v26 = vpop.f32.mrb[13].mxu0  ;;  %v483_v31 = vadd.f32 %v470_v25, %v58_v20  ;;  %v822_v32 = vpop.f32.mrb[13].mxu1  ;;  %v616_v6 = vcombine.low %v594_v3, %v601_v1 }
 0x106   :  { %v424_v33 = vpop.f32.mrb[14].mxu0  ;;  %v473_v37 = vpop.f32.mrb[14].mxu1  ;;  %v500_v47 = vld [vmem:[#allocation2 + $0x4] sm:$0x1]  ;;  %v501_v48 = vld [vmem:[#allocation2 + $0x5] sm:$0x1] }
 0x107   :  { %491 = vst.msk [vmem:[#allocation2 + $0x6] sm:$0x1] %vm42_vm2, %v482_v24  ;;  %v817_v38 = vpop.f32.mrb[15].mxu0  ;;  %492 = vst.msk [vmem:[#allocation2 + $0x7] sm:$0x1] %vm42_vm2, %v483_v31  ;;  %v823_v43 = vpop.f32.mrb[15].mxu1  ;;  %v558_v53 = vmul.f32 %v868_v42, %v500_v47  ;;  %v560_v54 = vmul.f32 %v870_v46, %v501_v48  ;;  %v624_v8 = vrot.slane %v616_v6, %v593_v59 }
 0x109   :  { %v586_v63 = vcombine.low %v558_v53, %v560_v54 }
 0x10b   :  { %v608_v4 = vrot.slane %v586_v63, %v593_v59 }
 0x10e   :  { %v502_v57 = vld [vmem:[#allocation2 + $0x6] sm:$0x1]  ;;  %v503_v60 = vld [vmem:[#allocation2 + $0x7] sm:$0x1] }
 0x10f   :  { %v562_v61 = vmul.f32 %v872_v52, %v502_v57  ;;  %v564_v62 = vmul.f32 %v874_v56, %v503_v60 }
 0x111   :  { %v587_v2 = vcombine.low %v562_v61, %v564_v62 }
 0x113   :  { %v615_v5 = vrot.slane %v587_v2, %v593_v59 }
 0x115   :  { %v617_v7 = vcombine.low %v608_v4, %v615_v5 }
 0x117   :  { %v631_v9 = vrot.slane %v617_v7, %v593_v59 }
 0x119   :  { %v632_v10 = vcombine.low %v624_v8, %v631_v9 }
 0x11b   :  { %833 = vmatmul.mubr.msk.f32.vlgmr.msra.gmra.mrb[16].mxu0 %vm633_vm3, %v632_v10 }
 0x1ee   :  { %v702_v13 = vpop.f32.mrb[16].mxu0 }
 0x1ef   :  { %v703_v14 = vadd.f32 %v752_v39, %v702_v13  ;;  %v834_v15 = vpop.f32.mrb[17].mxu0 }
 0x1f1   :  { %706 = vmax.xlane.f32.xlu0 %v703_v14  ;;  %v725_v17 = vmul.f32 %v754_v16, %v703_v14 }
 0x1f5   :  { %726 = vadd.xlane.f32.xlu0 %v725_v17 }
 0x27e   :  { %v707_v18 = vpop.xlane.xlu0 %706 }
 0x27f   :  { %v708_v19 = vsub.f32 %v703_v14, %v707_v18 }
 0x281   :  { %v709_v20 = vmul.f32 1.442695, %v708_v19 }
 0x282   :  { %v727_v25 = vpop.xlane.xlu0 %726 }
 0x283   :  { %875 = vpow2.f32 %v709_v20 }
 0x28d   :  { %v876_v21 = vpop.eup %875 }
 0x28e   :  { %711 = vadd.xlane.f32.xlu1 %v876_v21 }
 0x31b   :  { %v712_v29 = vpop.xlane.xlu1 %711 }
 0x31c   :  { %877 = vlog2.f32 %v712_v29 }
 0x326   :  { %v878_v22 = vpop.eup %877 }
 0x327   :  { %v714_v23 = vmul.f32 0.6931472, %v878_v22 }
 0x329   :  { %v715_v24 = vadd.f32 %v714_v23, %v707_v18 }
 0x32b   :  { %v728_v26 = vsub.f32 %v715_v24, %v727_v25 }
 0x32d   :  { %730 = vst.msk [vmem:[%s1084_s6] sm:$0xff] %vm729_vm5, %v728_v26 }
 0x32e   :  { %735 = vsyncpa [#allocation4], 1 }

</bundles_post_ra>
